<compile_context>
chip_gen: v5e
topology: v5e:2x2
jax: 0.10.0
libtpu: 0.0.40
codegen_flags: <defaults>
</compile_context>

<pallas_src>
import jax
import jax.numpy as jnp
from jax.experimental import pallas as pl
from jax.experimental.pallas import tpu as pltpu

N, H, W = 2, 16, 16
C = 8                       # in_channels == out_channels (identity shortcut)
WC = W * C                  # 128 -> exactly one full lane width
NH = N * H                  # 32 rows
EPS = 1e-5
INV_NHW = 1.0 / float(N * H * W)

# TODO(synk): stride != 1 shortcut (1x1 conv + BN downsample) not implemented;
#             this covers the module's default stride=1 identity-shortcut path.
# TODO(synk): at real ResNet sizes add a ("parallel",...) grid over N/H tiles
#             (>=256 LHS rows per dot on v6e/v7x for MXU fill, both TCs on v7x)
#             and re-derive tile sizes against v7x's 64 MiB VMEM; also switch
#             the banded K=3*W*C weights to per-dy accumulating
#             (M,Cin)x(Cin,Cout) dots once C >= 128 (banded form is ~81% zeros).
# TODO(synk): bf16 conv-weight operands would halve weight DMA / MXU passes,
#             but bf16 rounding risks the 3e-4 tolerance vs the f32 reference;
#             kept f32 here.


def _resblock_kernel(x_ref, w1_ref, g1_ref, b1_ref, w2_ref, g2_ref, b2_ref,
                     o_ref):
    x = x_ref[...]                                   # (NH, WC) lane-dense f32

    # Per-image vertical SAME padding as row masks (no halo scratch): after a
    # cyclic sublane roll, rows with h==0 (h==H-1) have no valid row above
    # (below) — they wrapped across the image boundary and must be zeroed.
    row = jax.lax.broadcasted_iota(jnp.int32, (NH, WC), 0)
    h_idx = row % H
    top = h_idx == 0
    bot = h_idx == H - 1

    def conv3x3(a, w_ref):
        # Row-shifted slabs via XLU sublane rolls (positive shifts only).
        up = jnp.where(top, 0.0, pltpu.roll(a, 1, axis=0))        # x[h-1]
        dn = jnp.where(bot, 0.0, pltpu.roll(a, NH - 1, axis=0))   # x[h+1]
        # 3 accumulating (NH,WC)x(WC,WC) MXU dots; banded weights bake in the
        # horizontal (dx) taps and the left/right SAME zero padding.
        acc = jnp.dot(up, w_ref[0], preferred_element_type=jnp.float32)
        acc += jnp.dot(a, w_ref[1], preferred_element_type=jnp.float32)
        acc += jnp.dot(dn, w_ref[2], preferred_element_type=jnp.float32)
        return acc

    def bn(acc, g, b):
        # training-mode batch stats (biased variance) in one pass.
        s = jnp.sum(acc, axis=0, keepdims=True)               # (1, WC) sum x
        q = jnp.sum(acc * acc, axis=0, keepdims=True)         # (1, WC) sum x^2
        stats = jnp.concatenate([s, q], axis=0)               # (2, WC)
        # per-channel total over the W lane groups (lane i holds channel i%C):
        # cyclic lane rotate-and-add butterfly, log2(W)=4 XLU rolls.
        for shift in (C, 2 * C, 4 * C, 8 * C):                 # 8, 16, 32, 64
            stats = stats + pltpu.roll(stats, shift, axis=1)
        stats = stats * INV_NHW                                # -> E[x], E[x^2]
        mean_l = stats[0:1, :]
        var_l = stats[1:2, :] - mean_l * mean_l
        scale_l = jax.lax.rsqrt(var_l + EPS) * g               # EUP rsqrt
        return (acc - mean_l) * scale_l + b

    # conv1 -> bn1 -> relu
    h1 = jnp.maximum(bn(conv3x3(x, w1_ref), g1_ref[...], b1_ref[...]), 0.0)
    # conv2 -> bn2
    h2 = bn(conv3x3(h1, w2_ref), g2_ref[...], b2_ref[...])
    # identity shortcut (stride == 1) + final relu; lane-dense (32,128) store.
    o_ref[...] = jnp.maximum(h2 + x, 0.0)


def _banded_conv_weights(w_oihw):
    """OIHW (C,C,3,3) 3x3 weights -> (3, W*C, W*C) per-dy banded matrices.

    m[dy, u*C+ci, x*C+co] = w_hwio[dy, u-x+1, ci, co] (else 0), so the
    dy-shifted activation slab times m[dy] realizes the dx taps AND the SAME
    left/right zero-padding; only the vertical (dy) halo needs the row masks.
    """
    w = jnp.transpose(w_oihw, (2, 3, 1, 0)).astype(jnp.float32)   # HWIO (3,3,C,C)
    u = jnp.arange(W)[:, None, None]
    xx = jnp.arange(W)[None, :, None]
    d = jnp.arange(3)[None, None, :]
    taps = (u == xx + d - 1).astype(jnp.float32)                  # (W, W, 3)
    m = jnp.einsum('uxd,ydio->yuixo', taps, w)                    # (3, W, C, W, C)
    return m.reshape(3, WC, WC)                                   # (3, 128, 128)


def _lane_tile(v):
    # per-channel param -> laid out along lanes once: index w*C + c -> v[c]
    return jnp.tile(v.reshape(1, C).astype(jnp.float32), (1, W))  # (1, W*C)


def resblock_pallas(x_nchw, w1_oihw, g1, b1, w2_oihw, g2, b2):
    """x: NCHW (N,C,H,W); conv weights OIHW (C,C,3,3) bias=False; g/b: (C,)."""
    # TODO(synk): consecutive ResBlocks should keep activations in this
    #             lane-dense layout instead of NCHW <-> (N*H, W*C) transposes
    #             around every pallas_call.
    x_dense = jnp.transpose(x_nchw, (0, 2, 3, 1)).reshape(NH, WC)
    w1m = _banded_conv_weights(w1_oihw)
    w2m = _banded_conv_weights(w2_oihw)
    g1l, b1l, g2l, b2l = map(_lane_tile, (g1, b1, g2, b2))

    vmem = pl.BlockSpec(memory_space=pltpu.MemorySpace.VMEM)
    out = pl.pallas_call(
        _resblock_kernel,
        out_shape=jax.ShapeDtypeStruct((NH, WC), jnp.float32),
        in_specs=[vmem] * 7,
        out_specs=vmem,
    )(x_dense, w1m, g1l, b1l, w2m, g2l, b2l)
    return jnp.transpose(out.reshape(N, H, W, C), (0, 3, 1, 2))   # back to NCHW


# --------------------------- pure-JAX reference -------------------------------
def _conv3x3_ref(x, w):
    return jax.lax.conv_general_dilated(
        x, w, window_strides=(1, 1), padding='SAME',
        dimension_numbers=('NCHW', 'OIHW', 'NCHW'))


def _bn_ref(x, g, b):
    m = x.mean(axis=(0, 2, 3), keepdims=True)
    v = ((x - m) ** 2).mean(axis=(0, 2, 3), keepdims=True)
    return (x - m) * jax.lax.rsqrt(v + EPS) * g.reshape(1, C, 1, 1) \
        + b.reshape(1, C, 1, 1)


def resblock_ref(x, w1, g1, b1, w2, g2, b2):
    out = jax.nn.relu(_bn_ref(_conv3x3_ref(x, w1), g1, b1))
    out = _bn_ref(_conv3x3_ref(out, w2), g2, b2)
    return jax.nn.relu(out + x)


if __name__ == "__main__":
    key = jax.random.PRNGKey(0)
    kx, k1, k2, kg1, kb1, kg2, kb2 = jax.random.split(key, 7)

    x = jax.random.normal(kx, (N, C, H, W), jnp.float32)           # NCHW
    w1 = 0.2 * jax.random.normal(k1, (C, C, 3, 3), jnp.float32)    # OIHW, bias=False
    w2 = 0.2 * jax.random.normal(k2, (C, C, 3, 3), jnp.float32)
    g1 = 1.0 + 0.1 * jax.random.normal(kg1, (C,), jnp.float32)
    b1 = 0.1 * jax.random.normal(kb1, (C,), jnp.float32)
    g2 = 1.0 + 0.1 * jax.random.normal(kg2, (C,), jnp.float32)
    b2 = 0.1 * jax.random.normal(kb2, (C,), jnp.float32)

    out = jax.block_until_ready(resblock_pallas(x, w1, g1, b1, w2, g2, b2))
    ref = jax.block_until_ready(resblock_ref(x, w1, g1, b1, w2, g2, b2))

    assert out.shape == (N, C, H, W)
    err = jnp.max(jnp.abs(out - ref))
    assert jnp.allclose(out, ref, atol=3e-4, rtol=3e-4), f"max abs err {err}"
    print("KERNEL_OK")
</pallas_src>

<mosaic_0001>
module attributes {stable_mosaic.version = 11 : i64} {
  func.func @_resblock_kernel(%arg0: memref<32x128xf32, #tpu.memory_space<vmem>>, %arg1: memref<3x128x128xf32, #tpu.memory_space<vmem>>, %arg2: memref<1x128xf32, #tpu.memory_space<vmem>>, %arg3: memref<1x128xf32, #tpu.memory_space<vmem>>, %arg4: memref<3x128x128xf32, #tpu.memory_space<vmem>>, %arg5: memref<1x128xf32, #tpu.memory_space<vmem>>, %arg6: memref<1x128xf32, #tpu.memory_space<vmem>>, %arg7: memref<32x128xf32, #tpu.memory_space<vmem>>) attributes {dimension_semantics = [], scalar_prefetch = 0 : i64, scratch_operands = 0 : i64, tpu.core_type = #tpu.core_type<tc>} {
    %c0 = arith.constant 0 : index
    %c0_0 = arith.constant 0 : index
    %0 = vector.load %arg0[%c0, %c0_0] : memref<32x128xf32, #tpu.memory_space<vmem>>, vector<32x128xf32>
    %1 = tpu.iota {dimensions = array<i32: 0>} : vector<32x128xi32>
    %c16_i32 = arith.constant 16 : i32
    %c0_i32 = arith.constant 0 : i32
    %2 = arith.cmpi eq, %c16_i32, %c0_i32 : i32
    %c1_i32 = arith.constant 1 : i32
    %3 = arith.select %2, %c1_i32, %c16_i32 : i32
    %4 = vector.broadcast %3 : i32 to vector<32x128xi32>
    %5 = arith.remsi %1, %4 : vector<32x128xi32>
    %c0_i32_1 = arith.constant 0 : i32
    %6 = vector.broadcast %c0_i32_1 : i32 to vector<32x128xi32>
    %7 = arith.cmpi ne, %5, %6 : vector<32x128xi32>
    %c0_i32_2 = arith.constant 0 : i32
    %8 = vector.broadcast %c0_i32_2 : i32 to vector<32x128xi32>
    %9 = arith.cmpi slt, %5, %8 : vector<32x128xi32>
    %c0_i32_3 = arith.constant 0 : i32
    %10 = arith.cmpi slt, %3, %c0_i32_3 : i32
    %11 = vector.broadcast %10 : i1 to vector<32x128xi1>
    %12 = vector.broadcast %11 : vector<32x128xi1> to vector<32x128xi1>
    %13 = arith.xori %9, %12 : vector<32x128xi1>
    %14 = arith.andi %13, %7 : vector<32x128xi1>
    %15 = vector.broadcast %3 : i32 to vector<32x128xi32>
    %16 = arith.addi %5, %15 : vector<32x128xi32>
    %17 = arith.select %14, %16, %5 : vector<32x128xi1>, vector<32x128xi32>
    %c0_i32_4 = arith.constant 0 : i32
    %18 = vector.broadcast %c0_i32_4 : i32 to vector<32x128xi32>
    %19 = arith.cmpi eq, %17, %18 : vector<32x128xi32>
    %c15_i32 = arith.constant 15 : i32
    %20 = vector.broadcast %c15_i32 : i32 to vector<32x128xi32>
    %21 = arith.cmpi eq, %17, %20 : vector<32x128xi32>
    %c1_i32_5 = arith.constant 1 : i32
    %22 = tpu.dynamic_rotate %0 by %c1_i32_5 dim 0 : vector<32x128xf32>, i32 -> vector<32x128xf32>
    %cst = arith.constant 0.000000e+00 : f32
    %23 = vector.broadcast %cst : f32 to vector<32x128xf32>
    %24 = arith.select %19, %23, %22 : vector<32x128xi1>, vector<32x128xf32>
    %c31_i32 = arith.constant 31 : i32
    %25 = tpu.dynamic_rotate %0 by %c31_i32 dim 0 : vector<32x128xf32>, i32 -> vector<32x128xf32>
    %cst_6 = arith.constant 0.000000e+00 : f32
    %26 = vector.broadcast %cst_6 : f32 to vector<32x128xf32>
    %27 = arith.select %21, %26, %25 : vector<32x128xi1>, vector<32x128xf32>
    %c0_7 = arith.constant 0 : index
    %c0_8 = arith.constant 0 : index
    %c0_9 = arith.constant 0 : index
    %28 = vector.load %arg1[%c0_7, %c0_8, %c0_9] : memref<3x128x128xf32, #tpu.memory_space<vmem>>, vector<1x128x128xf32>
    %29 = vector.shape_cast %28 : vector<1x128x128xf32> to vector<128x128xf32>
    %cst_10 = arith.constant dense<0.000000e+00> : vector<32x128xf32>
    %30 = tpu.matmul %24, %29, %cst_10 {dimension_numbers = #tpu.dot_dimension_numbers<[1], [0], [0], [1], [0, 0, 1, 1], [], []>} : vector<32x128xf32>, vector<128x128xf32>, vector<32x128xf32> -> vector<32x128xf32>
    %c1 = arith.constant 1 : index
    %c0_11 = arith.constant 0 : index
    %c0_12 = arith.constant 0 : index
    %31 = vector.load %arg1[%c1, %c0_11, %c0_12] : memref<3x128x128xf32, #tpu.memory_space<vmem>>, vector<1x128x128xf32>
    %32 = vector.shape_cast %31 : vector<1x128x128xf32> to vector<128x128xf32>
    %cst_13 = arith.constant dense<0.000000e+00> : vector<32x128xf32>
    %33 = tpu.matmul %0, %32, %cst_13 {dimension_numbers = #tpu.dot_dimension_numbers<[1], [0], [0], [1], [0, 0, 1, 1], [], []>} : vector<32x128xf32>, vector<128x128xf32>, vector<32x128xf32> -> vector<32x128xf32>
    %34 = arith.addf %30, %33 : vector<32x128xf32>
    %c2 = arith.constant 2 : index
    %c0_14 = arith.constant 0 : index
    %c0_15 = arith.constant 0 : index
    %35 = vector.load %arg1[%c2, %c0_14, %c0_15] : memref<3x128x128xf32, #tpu.memory_space<vmem>>, vector<1x128x128xf32>
    %36 = vector.shape_cast %35 : vector<1x128x128xf32> to vector<128x128xf32>
    %cst_16 = arith.constant dense<0.000000e+00> : vector<32x128xf32>
    %37 = tpu.matmul %27, %36, %cst_16 {dimension_numbers = #tpu.dot_dimension_numbers<[1], [0], [0], [1], [0, 0, 1, 1], [], []>} : vector<32x128xf32>, vector<128x128xf32>, vector<32x128xf32> -> vector<32x128xf32>
    %38 = arith.addf %34, %37 : vector<32x128xf32>
    %c0_17 = arith.constant 0 : index
    %c0_18 = arith.constant 0 : index
    %39 = vector.load %arg2[%c0_17, %c0_18] : memref<1x128xf32, #tpu.memory_space<vmem>>, vector<1x128xf32>
    %c0_19 = arith.constant 0 : index
    %c0_20 = arith.constant 0 : index
    %40 = vector.load %arg3[%c0_19, %c0_20] : memref<1x128xf32, #tpu.memory_space<vmem>>, vector<1x128xf32>
    %cst_21 = arith.constant dense<0.000000e+00> : vector<128xf32>
    %41 = vector.multi_reduction <add>, %38, %cst_21 [0] : vector<32x128xf32> to vector<128xf32>
    %42 = vector.shape_cast %41 : vector<128xf32> to vector<1x128xf32>
    %43 = arith.mulf %38, %38 : vector<32x128xf32>
    %cst_22 = arith.constant dense<0.000000e+00> : vector<128xf32>
    %44 = vector.multi_reduction <add>, %43, %cst_22 [0] : vector<32x128xf32> to vector<128xf32>
    %45 = vector.shape_cast %44 : vector<128xf32> to vector<1x128xf32>
    %46 = tpu.concatenate %42, %45 in 0 : vector<1x128xf32>, vector<1x128xf32> -> vector<2x128xf32>
    %c8_i32 = arith.constant 8 : i32
    %47 = tpu.dynamic_rotate %46 by %c8_i32 dim 1 : vector<2x128xf32>, i32 -> vector<2x128xf32>
    %48 = arith.addf %46, %47 : vector<2x128xf32>
    %c16_i32_23 = arith.constant 16 : i32
    %49 = tpu.dynamic_rotate %48 by %c16_i32_23 dim 1 : vector<2x128xf32>, i32 -> vector<2x128xf32>
    %50 = arith.addf %48, %49 : vector<2x128xf32>
    %c32_i32 = arith.constant 32 : i32
    %51 = tpu.dynamic_rotate %50 by %c32_i32 dim 1 : vector<2x128xf32>, i32 -> vector<2x128xf32>
    %52 = arith.addf %50, %51 : vector<2x128xf32>
    %c64_i32 = arith.constant 64 : i32
    %53 = tpu.dynamic_rotate %52 by %c64_i32 dim 1 : vector<2x128xf32>, i32 -> vector<2x128xf32>
    %54 = arith.addf %52, %53 : vector<2x128xf32>
    %cst_24 = arith.constant 0.001953125 : f32
    %55 = vector.broadcast %cst_24 : f32 to vector<2x128xf32>
    %56 = arith.mulf %54, %55 : vector<2x128xf32>
    %57 = vector.extract_strided_slice %56 {offsets = [0, 0], sizes = [1, 128], strides = [1, 1]} : vector<2x128xf32> to vector<1x128xf32>
    %58 = vector.extract_strided_slice %56 {offsets = [1, 0], sizes = [1, 128], strides = [1, 1]} : vector<2x128xf32> to vector<1x128xf32>
    %59 = arith.mulf %57, %57 : vector<1x128xf32>
    %60 = arith.subf %58, %59 : vector<1x128xf32>
    %cst_25 = arith.constant 9.99999974E-6 : f32
    %61 = vector.broadcast %cst_25 : f32 to vector<1x128xf32>
    %62 = arith.addf %60, %61 : vector<1x128xf32>
    %63 = math.rsqrt %62 : vector<1x128xf32>
    %64 = arith.mulf %63, %39 : vector<1x128xf32>
    %65 = vector.broadcast %57 : vector<1x128xf32> to vector<32x128xf32>
    %66 = arith.subf %38, %65 : vector<32x128xf32>
    %67 = vector.broadcast %64 : vector<1x128xf32> to vector<32x128xf32>
    %68 = arith.mulf %66, %67 : vector<32x128xf32>
    %69 = vector.broadcast %40 : vector<1x128xf32> to vector<32x128xf32>
    %70 = arith.addf %68, %69 : vector<32x128xf32>
    %cst_26 = arith.constant 0.000000e+00 : f32
    %71 = vector.broadcast %cst_26 : f32 to vector<32x128xf32>
    %72 = arith.maximumf %70, %71 : vector<32x128xf32>
    %c1_i32_27 = arith.constant 1 : i32
    %73 = tpu.dynamic_rotate %72 by %c1_i32_27 dim 0 : vector<32x128xf32>, i32 -> vector<32x128xf32>
    %cst_28 = arith.constant 0.000000e+00 : f32
    %74 = vector.broadcast %cst_28 : f32 to vector<32x128xf32>
    %75 = arith.select %19, %74, %73 : vector<32x128xi1>, vector<32x128xf32>
    %c31_i32_29 = arith.constant 31 : i32
    %76 = tpu.dynamic_rotate %72 by %c31_i32_29 dim 0 : vector<32x128xf32>, i32 -> vector<32x128xf32>
    %cst_30 = arith.constant 0.000000e+00 : f32
    %77 = vector.broadcast %cst_30 : f32 to vector<32x128xf32>
    %78 = arith.select %21, %77, %76 : vector<32x128xi1>, vector<32x128xf32>
    %c0_31 = arith.constant 0 : index
    %c0_32 = arith.constant 0 : index
    %c0_33 = arith.constant 0 : index
    %79 = vector.load %arg4[%c0_31, %c0_32, %c0_33] : memref<3x128x128xf32, #tpu.memory_space<vmem>>, vector<1x128x128xf32>
    %80 = vector.shape_cast %79 : vector<1x128x128xf32> to vector<128x128xf32>
    %cst_34 = arith.constant dense<0.000000e+00> : vector<32x128xf32>
    %81 = tpu.matmul %75, %80, %cst_34 {dimension_numbers = #tpu.dot_dimension_numbers<[1], [0], [0], [1], [0, 0, 1, 1], [], []>} : vector<32x128xf32>, vector<128x128xf32>, vector<32x128xf32> -> vector<32x128xf32>
    %c1_35 = arith.constant 1 : index
    %c0_36 = arith.constant 0 : index
    %c0_37 = arith.constant 0 : index
    %82 = vector.load %arg4[%c1_35, %c0_36, %c0_37] : memref<3x128x128xf32, #tpu.memory_space<vmem>>, vector<1x128x128xf32>
    %83 = vector.shape_cast %82 : vector<1x128x128xf32> to vector<128x128xf32>
    %cst_38 = arith.constant dense<0.000000e+00> : vector<32x128xf32>
    %84 = tpu.matmul %72, %83, %cst_38 {dimension_numbers = #tpu.dot_dimension_numbers<[1], [0], [0], [1], [0, 0, 1, 1], [], []>} : vector<32x128xf32>, vector<128x128xf32>, vector<32x128xf32> -> vector<32x128xf32>
    %85 = arith.addf %81, %84 : vector<32x128xf32>
    %c2_39 = arith.constant 2 : index
    %c0_40 = arith.constant 0 : index
    %c0_41 = arith.constant 0 : index
    %86 = vector.load %arg4[%c2_39, %c0_40, %c0_41] : memref<3x128x128xf32, #tpu.memory_space<vmem>>, vector<1x128x128xf32>
    %87 = vector.shape_cast %86 : vector<1x128x128xf32> to vector<128x128xf32>
    %cst_42 = arith.constant dense<0.000000e+00> : vector<32x128xf32>
    %88 = tpu.matmul %78, %87, %cst_42 {dimension_numbers = #tpu.dot_dimension_numbers<[1], [0], [0], [1], [0, 0, 1, 1], [], []>} : vector<32x128xf32>, vector<128x128xf32>, vector<32x128xf32> -> vector<32x128xf32>
    %89 = arith.addf %85, %88 : vector<32x128xf32>
    %c0_43 = arith.constant 0 : index
    %c0_44 = arith.constant 0 : index
    %90 = vector.load %arg5[%c0_43, %c0_44] : memref<1x128xf32, #tpu.memory_space<vmem>>, vector<1x128xf32>
    %c0_45 = arith.constant 0 : index
    %c0_46 = arith.constant 0 : index
    %91 = vector.load %arg6[%c0_45, %c0_46] : memref<1x128xf32, #tpu.memory_space<vmem>>, vector<1x128xf32>
    %cst_47 = arith.constant dense<0.000000e+00> : vector<128xf32>
    %92 = vector.multi_reduction <add>, %89, %cst_47 [0] : vector<32x128xf32> to vector<128xf32>
    %93 = vector.shape_cast %92 : vector<128xf32> to vector<1x128xf32>
    %94 = arith.mulf %89, %89 : vector<32x128xf32>
    %cst_48 = arith.constant dense<0.000000e+00> : vector<128xf32>
    %95 = vector.multi_reduction <add>, %94, %cst_48 [0] : vector<32x128xf32> to vector<128xf32>
    %96 = vector.shape_cast %95 : vector<128xf32> to vector<1x128xf32>
    %97 = tpu.concatenate %93, %96 in 0 : vector<1x128xf32>, vector<1x128xf32> -> vector<2x128xf32>
    %c8_i32_49 = arith.constant 8 : i32
    %98 = tpu.dynamic_rotate %97 by %c8_i32_49 dim 1 : vector<2x128xf32>, i32 -> vector<2x128xf32>
    %99 = arith.addf %97, %98 : vector<2x128xf32>
    %c16_i32_50 = arith.constant 16 : i32
    %100 = tpu.dynamic_rotate %99 by %c16_i32_50 dim 1 : vector<2x128xf32>, i32 -> vector<2x128xf32>
    %101 = arith.addf %99, %100 : vector<2x128xf32>
    %c32_i32_51 = arith.constant 32 : i32
    %102 = tpu.dynamic_rotate %101 by %c32_i32_51 dim 1 : vector<2x128xf32>, i32 -> vector<2x128xf32>
    %103 = arith.addf %101, %102 : vector<2x128xf32>
    %c64_i32_52 = arith.constant 64 : i32
    %104 = tpu.dynamic_rotate %103 by %c64_i32_52 dim 1 : vector<2x128xf32>, i32 -> vector<2x128xf32>
    %105 = arith.addf %103, %104 : vector<2x128xf32>
    %cst_53 = arith.constant 0.001953125 : f32
    %106 = vector.broadcast %cst_53 : f32 to vector<2x128xf32>
    %107 = arith.mulf %105, %106 : vector<2x128xf32>
    %108 = vector.extract_strided_slice %107 {offsets = [0, 0], sizes = [1, 128], strides = [1, 1]} : vector<2x128xf32> to vector<1x128xf32>
    %109 = vector.extract_strided_slice %107 {offsets = [1, 0], sizes = [1, 128], strides = [1, 1]} : vector<2x128xf32> to vector<1x128xf32>
    %110 = arith.mulf %108, %108 : vector<1x128xf32>
    %111 = arith.subf %109, %110 : vector<1x128xf32>
    %cst_54 = arith.constant 9.99999974E-6 : f32
    %112 = vector.broadcast %cst_54 : f32 to vector<1x128xf32>
    %113 = arith.addf %111, %112 : vector<1x128xf32>
    %114 = math.rsqrt %113 : vector<1x128xf32>
    %115 = arith.mulf %114, %90 : vector<1x128xf32>
    %116 = vector.broadcast %108 : vector<1x128xf32> to vector<32x128xf32>
    %117 = arith.subf %89, %116 : vector<32x128xf32>
    %118 = vector.broadcast %115 : vector<1x128xf32> to vector<32x128xf32>
    %119 = arith.mulf %117, %118 : vector<32x128xf32>
    %120 = vector.broadcast %91 : vector<1x128xf32> to vector<32x128xf32>
    %121 = arith.addf %119, %120 : vector<32x128xf32>
    %122 = arith.addf %121, %0 : vector<32x128xf32>
    %cst_55 = arith.constant 0.000000e+00 : f32
    %123 = vector.broadcast %cst_55 : f32 to vector<32x128xf32>
    %124 = arith.maximumf %122, %123 : vector<32x128xf32>
    %c0_56 = arith.constant 0 : index
    %c0_57 = arith.constant 0 : index
    %125 = vector.load %arg7[%c0_56, %c0_57] : memref<32x128xf32, #tpu.memory_space<vmem>>, vector<32x128xf32>
    tpu.vector_store %arg7[%c0_56, %c0_57], %124 {strides = array<i32>} : memref<32x128xf32, #tpu.memory_space<vmem>>, vector<32x128xf32>,
    return
  }
}

</mosaic_0001>

<bundles_post_ra>
// kernel: tpu_custom_call.1
= control target key start
LH: loop header
LB: loop body
LE: loop exit
PB: predicated region body
PF: predicated region fallthrough
CT: control target
= control target key end

     0   :  { %12 = vsyncpa [#allocation3], 0  ;;  %s1110_s0 = inlined_call_operand.hbm [shape: f32[32,128], index: 0, kind: input, shape index: {}]   ;;  %s1111_s1 = inlined_call_operand.hbm [shape: f32[3,128,128], index: 1, kind: input, shape index: {}]   ;;  %s1112_s2 = inlined_call_operand.vmem [shape: f32[1,128], index: 2, kind: input, shape index: {}]   ;;  %s1113_s3 = inlined_call_operand.vmem [shape: f32[1,128], index: 3, kind: input, shape index: {}]   ;;  %s1114_s4 = inlined_call_operand.hbm [shape: f32[3,128,128], index: 4, kind: input, shape index: {}]   ;;  %s1115_s5 = inlined_call_operand.vmem [shape: f32[1,128], index: 5, kind: input, shape index: {}]   ;;  %s1116_s6 = inlined_call_operand.vmem [shape: f32[1,128], index: 6, kind: input, shape index: {}]   ;;  %s1117_s7 = inlined_call_operand.hbm [shape: f32[32,128], index: 7, kind: output, shape index: {}]  }
   0x1   :  { %13 = vsyncpa [#allocation6], 0 }
   0x2   :  { %14 = vsyncpa [#allocation4], 0  ;;  %s32_s26 = sshll.u32 %s1111_s1, 4  ;;  %s829_s27 = smov [#allocation5]   ;;  %s33_s26 = int_to_ptr.hbm [resolvable:$true] %s32_s26 }
   0x3   :  { %s34_s28 = sshll.u32 %s829_s27, 4  ;;  %s19_s8 = sshll.u32 %s1110_s0, 4  ;;  %s35_s28 = int_to_ptr.vmem [resolvable:$true] %s34_s28  ;;  %s20_s8 = int_to_ptr.hbm [resolvable:$true] %s19_s8 }
   0x4   :  { %s830_s9 = smov 128   ;;  %s831_s10 = smov 8  }
   0x5   :  { %40 = dma.hbm_to_vmem [thread:$0]  %s33_s26, 6144, %s35_s28, [#allocation6], %s830_s9, %s830_s9, %s831_s10  }
   0x6   :  { %s832_s11 = smov [#allocation2]   ;;  %s49_s1 = sshll.u32 %s1114_s4, 4  ;;  %s50_s1 = int_to_ptr.hbm [resolvable:$true] %s49_s1 }
   0x7   :  { %s21_s12 = sshll.u32 %s832_s11, 4  ;;  %s833_s0 = smov [#allocation7]   ;;  %s22_s12 = int_to_ptr.vmem [resolvable:$true] %s21_s12 }
   0x8   :  { %27 = dma.hbm_to_vmem [thread:$0]  %s20_s8, 512, %s22_s12, [#allocation3], %s830_s9, %s830_s9, %s831_s10  }
   0x9   :  { %s51_s15 = sshll.u32 %s833_s0, 4  ;;  %s52_s15 = int_to_ptr.vmem [resolvable:$true] %s51_s15 }
   0xa   :  { %57 = dma.hbm_to_vmem [thread:$0]  %s50_s1, 6144, %s52_s15, [#allocation6], %s830_s9, %s830_s9, %s831_s10  }
   0xb   :  { %823 = dma.done.wait [#allocation3], 512  }
   0xc   :  { %824 = vsyncadd [#allocation3], 4294966784 }
   0xd   :  { %825 = dma.done.wait [#allocation6], 12288  }
   0xe   :  { %826 = vsyncadd [#allocation6], 4294955008  ;;  %v272_v0 = vld [vmem:[#allocation5 + $0x178] sm:$0xff]  ;;  %v271_v1 = vld [vmem:[#allocation5 + $0x170] sm:$0xff]  ;;  %v78_v32 = vlaneseq  ;;  %vm330_vm6 = vcmask 1040384   ;;  %s834_s4 = smov 16  }
   0xf   :  { %v197_v2 = vld [vmem:[#allocation5 + $0xf8] sm:$0xff]  ;;  %273 = vmatpush.msra.mxu2 %v272_v0  ;;  %v196_v4 = vld [vmem:[#allocation5 + $0xf0] sm:$0xff]  ;;  %v270_v5 = vld [vmem:[#allocation5 + $0x168] sm:$0xff]  ;;  %s835_s16 = smov 32   ;;  %s836_s17 = smov 64  }
  0x10   :  { %198 = vmatpush.msra.mxu0 %v197_v2  ;;  %v180_v3 = vld [vmem:[#allocation5 + $0x78] sm:$0xff]  ;;  %v179_v6 = vld [vmem:[#allocation5 + $0x70] sm:$0xff]  ;;  %v195_v7 = vld [vmem:[#allocation5 + $0xe8] sm:$0xff]  ;;  %v900_v41 = vshrl.u32 %v78_v32, 7  ;;  %s644_s26 = sshll.u32 %s1117_s7, 4  ;;  %s645_s26 = int_to_ptr.hbm [resolvable:$true] %s644_s26 }
  0x11   :  { %227 = vmatpush.msra.mxu1 %v180_v3  ;;  %274 = vmatpush.msra.mxu2 %v271_v1  ;;  %v178_v8 = vld [vmem:[#allocation5 + $0x68] sm:$0xff]  ;;  %v269_v9 = vld [vmem:[#allocation5 + $0x160] sm:$0xff]  ;;  %v268_v12 = vld [vmem:[#allocation5 + $0x158] sm:$0xff] }
  0x12   :  { %199 = vmatpush.msra.mxu0 %v196_v4  ;;  %v194_v10 = vld [vmem:[#allocation5 + $0xe0] sm:$0xff]  ;;  %v193_v13 = vld [vmem:[#allocation5 + $0xd8] sm:$0xff]  ;;  %v267_v15 = vld [vmem:[#allocation5 + $0x150] sm:$0xff]  ;;  %vm156_vm0 = vcmp.lt.s32.totalorder %v900_v41, 7  ;;  %v87_v51 = vand.u32 15, %v900_v41  ;;  %vm143_vm1 = vcmp.lt.s32.totalorder %v900_v41, 1 }
  0x13   :  { %228 = vmatpush.msra.mxu1 %v179_v6  ;;  %275 = vmatpush.msra.mxu2 %v270_v5  ;;  %v177_v11 = vld [vmem:[#allocation5 + $0x60] sm:$0xff]  ;;  %v176_v14 = vld [vmem:[#allocation5 + $0x58] sm:$0xff]  ;;  %v192_v16 = vld [vmem:[#allocation5 + $0xd0] sm:$0xff]  ;;  %v80_v59 = vadd.s32 8, %v900_v41  ;;  %v81_v5 = vadd.s32 16, %v900_v41 }
  0x14   :  { %200 = vmatpush.msra.mxu0 %v195_v7  ;;  %v175_v17 = vld [vmem:[#allocation5 + $0x50] sm:$0xff]  ;;  %v266_v18 = vld [vmem:[#allocation5 + $0x148] sm:$0xff]  ;;  %v265_v21 = vld [vmem:[#allocation5 + $0x140] sm:$0xff]  ;;  %vm916_vm2 = vcmp.ne.s32.totalorder %v87_v51, 0 }
  0x15   :  { %229 = vmatpush.msra.mxu1 %v178_v8  ;;  %276 = vmatpush.msra.mxu2 %v269_v9  ;;  %v191_v19 = vld [vmem:[#allocation5 + $0xc8] sm:$0xff]  ;;  %v190_v22 = vld [vmem:[#allocation5 + $0xc0] sm:$0xff]  ;;  %v264_v24 = vld [vmem:[#allocation5 + $0x138] sm:$0xff]  ;;  %v94_v63 = vand.u32 15, %v80_v59  ;;  %v101_v7 = vand.u32 15, %v81_v5 }
  0x16   :  { %201 = vmatpush.msra.mxu0 %v194_v10  ;;  %v174_v20 = vld [vmem:[#allocation5 + $0x48] sm:$0xff]  ;;  %v173_v23 = vld [vmem:[#allocation5 + $0x40] sm:$0xff]  ;;  %v189_v25 = vld [vmem:[#allocation5 + $0xb8] sm:$0xff]  ;;  %v82_v10 = vadd.s32 24, %v900_v41 }
  0x17   :  { %230 = vmatpush.msra.mxu1 %v177_v11  ;;  %277 = vmatpush.msra.mxu2 %v268_v12  ;;  %v172_v26 = vld [vmem:[#allocation5 + $0x38] sm:$0xff]  ;;  %v263_v27 = vld [vmem:[#allocation5 + $0x130] sm:$0xff]  ;;  %v262_v29 = vld [vmem:[#allocation5 + $0x128] sm:$0xff]  ;;  %vm929_vm3 = vcmp.ne.s32.totalorder %v94_v63, 15  ;;  %vm946_vm4 = vcmp.ne.s32.totalorder %v101_v7, 0 }
  0x18   :  { %202 = vmatpush.msra.mxu0 %v193_v13  ;;  %v188_v28 = vld [vmem:[#allocation5 + $0xb0] sm:$0xff]  ;;  %v187_v31 = vld [vmem:[#allocation5 + $0xa8] sm:$0xff]  ;;  %v261_v34 = vld [vmem:[#allocation5 + $0x120] sm:$0xff]  ;;  %v108_v13 = vand.u32 15, %v82_v10 }
  0x19   :  { %231 = vmatpush.msra.mxu1 %v176_v14  ;;  %278 = vmatpush.msra.mxu2 %v267_v15  ;;  %v171_v30 = vld [vmem:[#allocation5 + $0x30] sm:$0xff]  ;;  %v170_v33 = vld [vmem:[#allocation5 + $0x28] sm:$0xff]  ;;  %v186_v35 = vld [vmem:[#allocation5 + $0xa0] sm:$0xff] }
  0x1a   :  { %203 = vmatpush.msra.mxu0 %v192_v16  ;;  %v260_v36 = vld [vmem:[#allocation5 + $0x118] sm:$0xff]  ;;  %v169_v37 = vld [vmem:[#allocation5 + $0x20] sm:$0xff]  ;;  %v898_v40 = vld [vmem:[#allocation2 + $0x8] sm:$0xff]  ;;  %vm955_vm5 = vcmp.ne.s32.totalorder %v108_v13, 15 }
  0x1b   :  { %232 = vmatpush.msra.mxu1 %v175_v17  ;;  %279 = vmatpush.msra.mxu2 %v266_v18  ;;  %v185_v38 = vld [vmem:[#allocation5 + $0x98] sm:$0xff]  ;;  %v896_v39 = vld [vmem:[#allocation2] sm:$0xff]  ;;  %v259_v44 = vld [vmem:[#allocation5 + $0x110] sm:$0xff]  ;;  %v153_v48 = vrot.slane %v898_v40, 1  ;;  %v140_v1 = vrot.slane %v898_v40, 7 }
  0x1c   :  { %204 = vmatpush.msra.mxu0 %v191_v19  ;;  %v168_v42 = vld [vmem:[#allocation5 + $0x18] sm:$0xff]  ;;  %v184_v45 = vld [vmem:[#allocation5 + $0x90] sm:$0xff]  ;;  %v152_v47 = vrot.slane %v896_v39, 1  ;;  %v258_v49 = vld [vmem:[#allocation5 + $0x108] sm:$0xff]  ;;  %v139_v52 = vrot.slane %v896_v39, 7 }
  0x1d   :  { %233 = vmatpush.msra.mxu1 %v174_v20  ;;  %280 = vmatpush.msra.mxu2 %v265_v21  ;;  %v902_v43 = vld [vmem:[#allocation2 + $0x18] sm:$0xff]  ;;  %v167_v46 = vld [vmem:[#allocation5 + $0x10] sm:$0xff]  ;;  %v183_v50 = vld [vmem:[#allocation5 + $0x88] sm:$0xff] }
  0x1e   :  { %205 = vmatpush.msra.mxu0 %v190_v22  ;;  %v142_v53 = vrot.slane %v902_v43, 7  ;;  %v166_v54 = vld [vmem:[#allocation5 + $0x8] sm:$0xff]  ;;  %v257_v55 = vld [vmem:[#allocation5 + $0x100] sm:$0xff]  ;;  %v159_v57 = vsel %vm156_vm0, %v152_v47, %v153_v48  ;;  %v920_v62 = vld [vmem:[#allocation2 + $0x10] sm:$0xff]  ;;  %v146_v4 = vsel %vm143_vm1, %v139_v52, %v140_v1  ;;  %v155_v6 = vrot.slane %v902_v43, 1 }
  0x1f   :  { %234 = vmatpush.msra.mxu1 %v173_v23  ;;  %281 = vmatpush.msra.mxu2 %v264_v24  ;;  %v182_v56 = vld [vmem:[#allocation5 + $0x80] sm:$0xff]  ;;  %v154_v0 = vrot.slane %v920_v62, 1  ;;  %v141_v8 = vrot.slane %v920_v62, 7  ;;  %v441_v10 = vld [vmem:[#allocation7 + $0xf0] sm:$0xff]  ;;  %v992_v13 = vld [vmem:[#allocation7 + $0x178] sm:$0xff] }
  0x20   :  { %206 = vmatpush.msra.mxu0 %v189_v25  ;;  %v165_v58 = vld [vmem:[#allocation5] sm:$0xff]  ;;  %v147_v60 = vsel %vm143_vm1, %v142_v53, %v139_v52  ;;  %v160_v14 = vsel %vm156_vm0, %v155_v6, %v152_v47 }
  0x21   :  { %235 = vmatpush.msra.mxu1 %v172_v26  ;;  %282 = vmatpush.msra.mxu2 %v263_v27  ;;  %v158_v2 = vsel %vm156_vm0, %v153_v48, %v154_v0  ;;  %v157_v9 = vsel %vm156_vm0, %v154_v0, %v155_v6  ;;  %v145_v11 = vsel %vm143_vm1, %v140_v1, %v141_v8 }
  0x22   :  { %207 = vmatpush.msra.mxu0 %v188_v28  ;;  %v144_v16 = vsel %vm143_vm1, %v141_v8, %v142_v53 }
  0x23   :  { %236 = vmatpush.msra.mxu1 %v171_v30  ;;  %283 = vmatpush.msra.mxu2 %v262_v29 }
  0x24   :  { %208 = vmatpush.msra.mxu0 %v187_v31 }
  0x25   :  { %237 = vmatpush.msra.mxu1 %v170_v33  ;;  %284 = vmatpush.msra.mxu2 %v261_v34 }
  0x26   :  { %209 = vmatpush.msra.mxu0 %v186_v35 }
  0x27   :  { %238 = vmatpush.msra.mxu1 %v169_v37  ;;  %285 = vmatpush.msra.mxu2 %v260_v36 }
  0x28   :  { %210 = vmatpush.msra.mxu0 %v185_v38 }
  0x29   :  { %239 = vmatpush.msra.mxu1 %v168_v42  ;;  %286 = vmatpush.msra.mxu2 %v259_v44 }
  0x2a   :  { %211 = vmatpush.msra.mxu0 %v184_v45 }
  0x2b   :  { %240 = vmatpush.msra.mxu1 %v167_v46  ;;  %287 = vmatpush.msra.mxu2 %v258_v49 }
  0x2c   :  { %212 = vmatpush.msra.mxu0 %v183_v50 }
  0x2d   :  { %241 = vmatpush.msra.mxu1 %v166_v54  ;;  %288 = vmatpush.msra.mxu2 %v257_v55 }
  0x2e   :  { %213 = vmatpush.msra.mxu0 %v182_v56  ;;  %289 = vmatmul.f32.vlgmr.msra.gmra.mxu2 %v159_v57 }
  0x2f   :  { %242 = vmatpush.msra.mxu1 %v165_v58  ;;  %214 = vmatmul.f32.vlgmr.msra.gmra.mxu0 %v896_v39 }
  0x30   :  { %659 = vmatmul.msk.f32.vlgmr.msra.gmra.mxu1 %vm916_vm2, %v147_v60 }
  0x31   :  { %518 = vmatpush.msrb.mxu1 %v992_v13 }
  0x36   :  { %663 = vmatmul.msk.f32.gmra.mxu2 %vm929_vm3, %v158_v2 }
  0x37   :  { %217 = vmatmul.f32.gmra.mxu0 %v898_v40 }
  0x38   :  { %246 = vmatmul.f32.gmra.mxu1 %v146_v4 }
  0x3e   :  { %295 = vmatmul.f32.gmra.mxu2 %v157_v9  ;;  %v442_v9 = vld [vmem:[#allocation7 + $0xf8] sm:$0xff] }
  0x3f   :  { %220 = vmatmul.f32.gmra.mxu0 %v920_v62  ;;  %443 = vmatpush.msra.mxu3 %v442_v9  ;;  %v503_v9 = vld [vmem:[#allocation7 + $0x108] sm:$0xff] }
  0x40   :  { %661 = vmatmul.msk.f32.gmra.mxu1 %vm946_vm4, %v145_v11  ;;  %v425_v11 = vld [vmem:[#allocation7 + $0x78] sm:$0xff] }
  0x41   :  { %444 = vmatpush.msra.mxu3 %v441_v10  ;;  %472 = vmatpush.msrb.mxu0 %v425_v11  ;;  %v410_v10 = vld [vmem:[#allocation7] sm:$0xff] }
  0x42   :  { %678 = vmatpush.msrb.mxu2 %v425_v11  ;;  %v502_v11 = vld [vmem:[#allocation7 + $0x100] sm:$0xff] }
  0x46   :  { %665 = vmatmul.msk.f32.gmra.mxu2 %vm955_vm5, %v160_v14  ;;  %v440_v14 = vld [vmem:[#allocation7 + $0xe8] sm:$0xff] }
  0x47   :  { %223 = vmatmul.f32.gmra.mxu0 %v902_v43  ;;  %445 = vmatpush.msra.mxu3 %v440_v14 }
  0x48   :  { %252 = vmatmul.f32.gmra.mxu1 %v144_v16  ;;  %v424_v16 = vld [vmem:[#allocation7 + $0x70] sm:$0xff] }
  0x49   :  { %473 = vmatpush.msrb.mxu0 %v424_v16  ;;  %679 = vmatpush.msrb.mxu2 %v424_v16 }
  0xac   :  { %v215_v17 = vpop.f32.mrf.mxu0 }
  0xad   :  { %v244_v18 = vpop.f32.mrf.mxu1 }
  0xae   :  { %v245_v26 = vadd.f32 %v244_v18, %v215_v17  ;;  %v995_v17 = vld [vmem:[#allocation7 + $0x170] sm:$0xff]  ;;  %v439_v18 = vld [vmem:[#allocation7 + $0xe0] sm:$0xff] }
  0xaf   :  { %519 = vmatpush.msrb.mxu1 %v995_v17  ;;  %446 = vmatpush.msra.mxu3 %v439_v18 }
  0xb1   :  { %v290_v19 = vpop.f32.mrf.mxu2 }
  0xb2   :  { %v966_v30 = vadd.f32 %v290_v19, %v245_v26  ;;  %v423_v19 = vld [vmem:[#allocation7 + $0x68] sm:$0xff]  ;;  %v1004_v26 = vld [vmem:[#allocation7 + $0x158] sm:$0xff] }
  0xb3   :  { %474 = vmatpush.msrb.mxu0 %v423_v19  ;;  %680 = vmatpush.msrb.mxu2 %v423_v19 }
  0xb4   :  { %v218_v20 = vpop.f32.mrf.mxu0  ;;  %v317_v36 = vmul.f32 %v966_v30, %v966_v30 }
  0xb5   :  { %v247_v21 = vpop.f32.mrf.mxu1 }
  0xb6   :  { %v248_v25 = vadd.f32 %v247_v21, %v218_v20  ;;  %v998_v20 = vld [vmem:[#allocation7 + $0x168] sm:$0xff]  ;;  %v438_v21 = vld [vmem:[#allocation7 + $0xd8] sm:$0xff] }
  0xb7   :  { %520 = vmatpush.msrb.mxu1 %v998_v20  ;;  %447 = vmatpush.msra.mxu3 %v438_v21 }
  0xb9   :  { %v293_v22 = vpop.f32.mrf.mxu2 }
  0xba   :  { %v964_v29 = vadd.f32 %v293_v22, %v248_v25  ;;  %v422_v22 = vld [vmem:[#allocation7 + $0x60] sm:$0xff]  ;;  %v421_v25 = vld [vmem:[#allocation7 + $0x58] sm:$0xff] }
  0xbb   :  { %475 = vmatpush.msrb.mxu0 %v422_v22  ;;  %681 = vmatpush.msrb.mxu2 %v422_v22 }
  0xbc   :  { %v221_v23 = vpop.f32.mrf.mxu0  ;;  %v318_v34 = vmul.f32 %v964_v29, %v964_v29  ;;  %v308_v37 = vadd.f32 %v964_v29, %v966_v30 }
  0xbd   :  { %v250_v24 = vpop.f32.mrf.mxu1  ;;  %476 = vmatpush.msrb.mxu0 %v421_v25  ;;  %682 = vmatpush.msrb.mxu2 %v421_v25 }
  0xbe   :  { %v251_v27 = vadd.f32 %v250_v24, %v221_v23  ;;  %v321_v44 = vadd.f32 %v318_v34, %v317_v36  ;;  %v1001_v23 = vld [vmem:[#allocation7 + $0x160] sm:$0xff]  ;;  %v437_v24 = vld [vmem:[#allocation7 + $0xd0] sm:$0xff]  ;;  %v419_v34 = vld [vmem:[#allocation7 + $0x48] sm:$0xff] }
  0xbf   :  { %521 = vmatpush.msrb.mxu1 %v1001_v23  ;;  %448 = vmatpush.msra.mxu3 %v437_v24  ;;  %v434_v36 = vld [vmem:[#allocation7 + $0xb8] sm:$0xff] }
  0xc1   :  { %v296_v28 = vpop.f32.mrf.mxu2  ;;  %522 = vmatpush.msrb.mxu1 %v1004_v26 }
  0xc2   :  { %v968_v31 = vadd.f32 %v296_v28, %v251_v27  ;;  %v436_v27 = vld [vmem:[#allocation7 + $0xc8] sm:$0xff]  ;;  %v420_v28 = vld [vmem:[#allocation7 + $0x50] sm:$0xff] }
  0xc3   :  { %449 = vmatpush.msra.mxu3 %v436_v27  ;;  %477 = vmatpush.msrb.mxu0 %v420_v28 }
  0xc4   :  { %v224_v32 = vpop.f32.mrf.mxu0  ;;  %v319_v38 = vmul.f32 %v968_v31, %v968_v31  ;;  %v309_v45 = vadd.f32 %v308_v37, %v968_v31  ;;  %683 = vmatpush.msrb.mxu2 %v420_v28  ;;  %v418_v37 = vld [vmem:[#allocation7 + $0x40] sm:$0xff] }
  0xc5   :  { %v253_v33 = vpop.f32.mrf.mxu1  ;;  %478 = vmatpush.msrb.mxu0 %v419_v34 }
  0xc6   :  { %v254_v35 = vadd.f32 %v253_v33, %v224_v32  ;;  %v322_v47 = vadd.f32 %v321_v44, %v319_v38  ;;  %v1007_v32 = vld [vmem:[#allocation7 + $0x150] sm:$0xff]  ;;  %v435_v33 = vld [vmem:[#allocation7 + $0xc0] sm:$0xff]  ;;  %684 = vmatpush.msrb.mxu2 %v419_v34  ;;  %v417_v44 = vld [vmem:[#allocation7 + $0x38] sm:$0xff] }
  0xc7   :  { %523 = vmatpush.msrb.mxu1 %v1007_v32  ;;  %450 = vmatpush.msra.mxu3 %v435_v33  ;;  %v1013_v38 = vld [vmem:[#allocation7 + $0x140] sm:$0xff] }
  0xc8   :  { %479 = vmatpush.msrb.mxu0 %v418_v37  ;;  %685 = vmatpush.msrb.mxu2 %v418_v37  ;;  %v720_v33 = vld [vmem:[%s1113_s3] ss:$0 sm:$0xff] }
  0xc9   :  { %v299_v42 = vpop.f32.mrf.mxu2  ;;  %451 = vmatpush.msra.mxu3 %v434_v36 }
  0xca   :  { %v979_v46 = vadd.f32 %v299_v42, %v254_v35  ;;  %v1010_v35 = vld [vmem:[#allocation7 + $0x148] sm:$0xff]  ;;  %v433_v42 = vld [vmem:[#allocation7 + $0xb0] sm:$0xff]  ;;  %480 = vmatpush.msrb.mxu0 %v417_v44  ;;  %686 = vmatpush.msrb.mxu2 %v417_v44 }
  0xcb   :  { %524 = vmatpush.msrb.mxu1 %v1010_v35  ;;  %452 = vmatpush.msra.mxu3 %v433_v42 }
  0xcc   :  { %v310_v48 = vadd.f32 %v309_v45, %v979_v46  ;;  %v320_v49 = vmul.f32 %v979_v46, %v979_v46  ;;  %v1016_v45 = vld [vmem:[#allocation7 + $0x138] sm:$0xff] }
  0xcd   :  { %525 = vmatpush.msrb.mxu1 %v1013_v38 }
  0xce   :  { %v311_v50 = vrot.slane %v310_v48, 4  ;;  %v323_v51 = vadd.f32 %v322_v47, %v320_v49  ;;  %v432_v47 = vld [vmem:[#allocation7 + $0xa8] sm:$0xff]  ;;  %v1019_v49 = vld [vmem:[#allocation7 + $0x130] sm:$0xff] }
  0xcf   :  { %526 = vmatpush.msrb.mxu1 %v1016_v45  ;;  %453 = vmatpush.msra.mxu3 %v432_v47 }
  0xd0   :  { %v312_v52 = vadd.f32 %v311_v50, %v310_v48  ;;  %v324_v53 = vrot.slane %v323_v51, 4  ;;  %v416_v48 = vld [vmem:[#allocation7 + $0x30] sm:$0xff]  ;;  %v431_v50 = vld [vmem:[#allocation7 + $0xa0] sm:$0xff] }
  0xd1   :  { %481 = vmatpush.msrb.mxu0 %v416_v48  ;;  %687 = vmatpush.msrb.mxu2 %v416_v48 }
  0xd2   :  { %v313_v54 = vrot.slane %v312_v52, 2  ;;  %v325_v55 = vadd.f32 %v324_v53, %v323_v51  ;;  %v415_v51 = vld [vmem:[#allocation7 + $0x28] sm:$0xff]  ;;  %527 = vmatpush.msrb.mxu1 %v1019_v49  ;;  %454 = vmatpush.msra.mxu3 %v431_v50 }
  0xd3   :  { %482 = vmatpush.msrb.mxu0 %v415_v51  ;;  %688 = vmatpush.msrb.mxu2 %v415_v51 }
  0xd4   :  { %v314_v56 = vadd.f32 %v313_v54, %v312_v52  ;;  %v326_v57 = vrot.slane %v325_v55, 2  ;;  %v1021_v52 = vld [vmem:[#allocation7 + $0x128] sm:$0xff]  ;;  %v430_v54 = vld [vmem:[#allocation7 + $0x98] sm:$0xff] }
  0xd5   :  { %528 = vmatpush.msrb.mxu1 %v1021_v52  ;;  %455 = vmatpush.msra.mxu3 %v430_v54 }
  0xd6   :  { %v315_v58 = vrot.slane %v314_v56, 1  ;;  %v327_v59 = vadd.f32 %v326_v57, %v325_v55  ;;  %v414_v55 = vld [vmem:[#allocation7 + $0x20] sm:$0xff] }
  0xd7   :  { %v506_v57 = vld [vmem:[#allocation7 + $0x120] sm:$0xff]  ;;  %483 = vmatpush.msrb.mxu0 %v414_v55  ;;  %689 = vmatpush.msrb.mxu2 %v414_v55 }
  0xd8   :  { %v328_v60 = vrot.slane %v327_v59, 1  ;;  %v316_v63 = vadd.f32 %v315_v58, %v314_v56  ;;  %v429_v58 = vld [vmem:[#allocation7 + $0x90] sm:$0xff]  ;;  %529 = vmatpush.msrb.mxu1 %v506_v57 }
  0xd9   :  { %456 = vmatpush.msra.mxu3 %v429_v58 }
  0xda   :  { %v329_v0 = vadd.f32 %v328_v60, %v327_v59  ;;  %v413_v59 = vld [vmem:[#allocation7 + $0x18] sm:$0xff] }
  0xdb   :  { %484 = vmatpush.msrb.mxu0 %v413_v59  ;;  %690 = vmatpush.msrb.mxu2 %v413_v59 }
  0xdc   :  { %v331_v1 = vsel %vm330_vm6, %v316_v63, %v329_v0  ;;  %v505_v63 = vld [vmem:[#allocation7 + $0x118] sm:$0xff]  ;;  %v428_v0 = vld [vmem:[#allocation7 + $0x88] sm:$0xff] }
  0xdd   :  { %332 = vrot.lane.b32.xlu0 %v331_v1, %s831_s10  ;;  %530 = vmatpush.msrb.mxu1 %v505_v63 }
  0xde   :  { %457 = vmatpush.msra.mxu3 %v428_v0 }
 0x14f   :  { %v333_v2 = vpop.permute.xlu0 %332 }
 0x150   :  { %v334_v4 = vadd.f32 %v333_v2, %v331_v1  ;;  %v412_v1 = vld [vmem:[#allocation7 + $0x10] sm:$0xff] }
 0x151   :  { %485 = vmatpush.msrb.mxu0 %v412_v1  ;;  %691 = vmatpush.msrb.mxu2 %v412_v1 }
 0x152   :  { %335 = vrot.lane.b32.xlu0 %v334_v4, %s834_s4 }
 0x1c4   :  { %v336_v5 = vpop.permute.xlu0 %335 }
 0x1c5   :  { %v337_v6 = vadd.f32 %v336_v5, %v334_v4  ;;  %v504_v4 = vld [vmem:[#allocation7 + $0x110] sm:$0xff]  ;;  %v427_v5 = vld [vmem:[#allocation7 + $0x80] sm:$0xff] }
 0x1c6   :  { %531 = vmatpush.msrb.mxu1 %v504_v4  ;;  %458 = vmatpush.msra.mxu3 %v427_v5 }
 0x1c7   :  { %338 = vrot.lane.b32.xlu1 %v337_v6, %s835_s16 }
 0x1c8   :  { %694 = vmatpush.msrb.mxu3 %v992_v13  ;;  %532 = vmatpush.msrb.mxu1 %v503_v9 }
 0x1ca   :  { %695 = vmatpush.msrb.mxu3 %v995_v17  ;;  %533 = vmatpush.msrb.mxu1 %v502_v11 }
 0x1cc   :  { %696 = vmatpush.msrb.mxu3 %v998_v20  ;;  %v719_v20 = vld [vmem:[%s1112_s2] ss:$0 sm:$0xff] }
 0x1ce   :  { %697 = vmatpush.msrb.mxu3 %v1001_v23 }
 0x1d0   :  { %698 = vmatpush.msrb.mxu3 %v1004_v26 }
 0x1d2   :  { %699 = vmatpush.msrb.mxu3 %v1007_v32 }
 0x1d4   :  { %700 = vmatpush.msrb.mxu3 %v1010_v35 }
 0x1d6   :  { %701 = vmatpush.msrb.mxu3 %v1013_v38 }
 0x1d8   :  { %702 = vmatpush.msrb.mxu3 %v1016_v45 }
 0x1da   :  { %703 = vmatpush.msrb.mxu3 %v1019_v49 }
 0x1dc   :  { %704 = vmatpush.msrb.mxu3 %v1021_v52 }
 0x1de   :  { %705 = vmatpush.msrb.mxu3 %v506_v57 }
 0x1e0   :  { %706 = vmatpush.msrb.mxu3 %v505_v63 }
 0x1e2   :  { %707 = vmatpush.msrb.mxu3 %v504_v4 }
 0x1e4   :  { %708 = vmatpush.msrb.mxu3 %v503_v9 }
 0x1e6   :  { %709 = vmatpush.msrb.mxu3 %v502_v11 }
 0x239   :  { %v339_v7 = vpop.permute.xlu1 %338 }
 0x23a   :  { %v988_v8 = vadd.f32 %v339_v7, %v337_v6 }
 0x23c   :  { %341 = vrot.lane.b32.xlu1 %v988_v8, %s836_s17 }
 0x2ae   :  { %v342_v53 = vpop.permute.xlu1 %341 }
 0x2af   :  { %v343_v56 = vadd.f32 %v342_v53, %v988_v8  ;;  %v411_v8 = vld [vmem:[#allocation7 + $0x8] sm:$0xff] }
 0x2b0   :  { %486 = vmatpush.msrb.mxu0 %v411_v8  ;;  %692 = vmatpush.msrb.mxu2 %v411_v8 }
 0x2b1   :  { %v344_v60 = vmul.f32 0.001953125, %v343_v56 }
 0x2b2   :  { %487 = vmatpush.msrb.mxu0 %v410_v10  ;;  %693 = vmatpush.msrb.mxu2 %v410_v10 }
 0x2b3   :  { %v345_v2 = vmul.f32 %v344_v60, %v344_v60  ;;  %v365_v22 = vperm.slane %v344_v60, 0 }
 0x2b5   :  { %v347_v6 = vrot.slane %v345_v2, 7  ;;  %v367_v25 = vsub.f32 %v964_v29, %v365_v22  ;;  %v368_v26 = vsub.f32 %v968_v31, %v365_v22  ;;  %v369_v27 = vsub.f32 %v979_v46, %v365_v22 }
 0x2b6   :  { %v366_v28 = vsub.f32 %v966_v30, %v365_v22 }
 0x2b7   :  { %v349_v7 = vsub.f32 %v344_v60, %v347_v6 }
 0x2b9   :  { %v350_v14 = vadd.f32 1e-05, %v349_v7 }
 0x2bb   :  { %723 = vrsqrt.f32 %v350_v14  ;;  %vm357_vm8 = vweird.f32 %v350_v14 }
 0x2c1   :  { %v724_v13 = vpop.eup %723 }
 0x2c2   :  { %v352_v16 = vmul.f32 %v724_v13, %v350_v14  ;;  %vm358_vm7 = vweird.f32 %v724_v13 }
 0x2c3   :  { %vm359_vm9 = vmor %vm357_vm8, %vm358_vm7 }
 0x2c4   :  { %v353_v18 = vmul.f32 %v724_v13, %v352_v16 }
 0x2c6   :  { %v354_v17 = vmul.f32 0.5, %v353_v18 }
 0x2c8   :  { %v355_v19 = vsub.f32 1.5, %v354_v17 }
 0x2ca   :  { %v356_v21 = vmul.f32 %v724_v13, %v355_v19 }
 0x2cc   :  { %v360_v23 = vsel %vm359_vm9, %v724_v13, %v356_v21 }
 0x2cd   :  { %v364_v24 = vmul.f32 %v719_v20, %v360_v23 }
 0x2cf   :  { %v370_v32 = vperm.slane %v364_v24, 1 }
 0x2d1   :  { %v371_v34 = vmul.f32 %v370_v32, %v366_v28  ;;  %v374_v35 = vmul.f32 %v370_v32, %v369_v27  ;;  %v372_v36 = vmul.f32 %v370_v32, %v367_v25  ;;  %v373_v37 = vmul.f32 %v370_v32, %v368_v26 }
 0x2d3   :  { %v378_v38 = vadd.f32 %v720_v33, %v371_v34  ;;  %v381_v42 = vadd.f32 %v720_v33, %v374_v35  ;;  %v379_v29 = vadd.f32 %v720_v33, %v372_v36  ;;  %v380_v44 = vadd.f32 %v720_v33, %v373_v37 }
 0x2d5   :  { %v382_v31 = vmax.f32 %v378_v38, 0.0  ;;  %v385_v46 = vmax.f32 %v381_v42, 0.0  ;;  %v383_v45 = vmax.f32 %v379_v29, 0.0  ;;  %v384_v30 = vmax.f32 %v380_v44, 0.0 }
 0x2d7   :  { %459 = vmatmul.f32.vlgmr.msra.gmra.mxu3 %v382_v31  ;;  %v386_v47 = vrot.slane %v382_v31, 7  ;;  %v389_v48 = vrot.slane %v385_v46, 7  ;;  %v387_v49 = vrot.slane %v383_v45, 7  ;;  %v388_v50 = vrot.slane %v384_v30, 7 }
 0x2d8   :  { %v398_v51 = vrot.slane %v382_v31, 1  ;;  %v399_v52 = vrot.slane %v383_v45, 1  ;;  %v400_v56 = vrot.slane %v384_v30, 1  ;;  %v401_v12 = vrot.slane %v385_v46, 1 }
 0x2d9   :  { %v393_v53 = vsel %vm143_vm1, %v389_v48, %v386_v47  ;;  %v391_v54 = vsel %vm143_vm1, %v387_v49, %v388_v50  ;;  %v392_v57 = vsel %vm143_vm1, %v386_v47, %v387_v49  ;;  %v390_v58 = vsel %vm143_vm1, %v388_v50, %v389_v48 }
 0x2da   :  { %667 = vmatmul.msk.f32.vlgmr.msrb.gmra.mxu0 %vm916_vm2, %v393_v53  ;;  %669 = vmatmul.msk.f32.vlgmr.msrb.gmra.mxu2 %vm946_vm4, %v391_v54  ;;  %v404_v55 = vsel %vm156_vm0, %v398_v51, %v399_v52  ;;  %v403_v61 = vsel %vm156_vm0, %v399_v52, %v400_v56  ;;  %v402_v59 = vsel %vm156_vm0, %v400_v56, %v401_v12 }
 0x2db   :  { %534 = vmatmul.f32.vlgmr.msrb.gmra.mxu1 %v404_v55  ;;  %v405_v60 = vsel %vm156_vm0, %v401_v12, %v398_v51 }
 0x2df   :  { %462 = vmatmul.f32.gmra.mxu3 %v383_v45 }
 0x2e2   :  { %491 = vmatmul.f32.gmra.mxu0 %v392_v57  ;;  %497 = vmatmul.f32.gmra.mxu2 %v390_v58 }
 0x2e3   :  { %671 = vmatmul.msk.f32.gmra.mxu1 %vm929_vm3, %v403_v61 }
 0x2e7   :  { %465 = vmatmul.f32.gmra.mxu3 %v384_v30 }
 0x2ef   :  { %468 = vmatmul.f32.gmra.mxu3 %v385_v46 }
 0x2f7   :  { %540 = vmatmul.f32.vlgmr.msrb.gmra.mxu3 %v402_v59 }
 0x2ff   :  { %673 = vmatmul.msk.f32.gmra.mxu3 %vm955_vm5, %v405_v60 }
 0x357   :  { %v489_v2 = vpop.f32.mrf.mxu0 }
 0x358   :  { %v535_v4 = vpop.f32.mrf.mxu1 }
 0x35a   :  { %v460_v63 = vpop.f32.mrf.mxu3 }
 0x35b   :  { %v490_v8 = vadd.f32 %v489_v2, %v460_v63 }
 0x35d   :  { %v495_v5 = vpop.f32.mrf.mxu2  ;;  %v1073_v41 = vadd.f32 %v535_v4, %v490_v8 }
 0x35f   :  { %v492_v6 = vpop.f32.mrf.mxu0  ;;  %v562_v18 = vmul.f32 %v1073_v41, %v1073_v41 }
 0x360   :  { %v538_v9 = vpop.f32.mrf.mxu1 }
 0x362   :  { %v463_v0 = vpop.f32.mrf.mxu3 }
 0x363   :  { %v493_v7 = vadd.f32 %v492_v6, %v463_v0  ;;  %v721_v0 = vld [vmem:[%s1115_s5] ss:$0 sm:$0xff]  ;;  %s837_s5 = smov [#allocation8]  }
 0x365   :  { %v1071_v11 = vadd.f32 %v538_v9, %v493_v7  ;;  %v498_v16 = vpop.f32.mrf.mxu2 }
 0x367   :  { %v563_v15 = vmul.f32 %v1071_v11, %v1071_v11  ;;  %v553_v19 = vadd.f32 %v1071_v11, %v1073_v41 }
 0x369   :  { %v566_v23 = vadd.f32 %v563_v15, %v562_v18 }
 0x36a   :  { %v466_v1 = vpop.f32.mrf.mxu3 }
 0x36b   :  { %v496_v14 = vadd.f32 %v495_v5, %v466_v1 }
 0x372   :  { %v469_v3 = vpop.f32.mrf.mxu3 }
 0x373   :  { %v499_v17 = vadd.f32 %v498_v16, %v469_v3 }
 0x37a   :  { %v541_v10 = vpop.f32.mrf.mxu3 }
 0x37b   :  { %v1075_v13 = vadd.f32 %v541_v10, %v496_v14  ;;  %v722_v10 = vld [vmem:[%s1116_s6] ss:$0 sm:$0xff]  ;;  %s642_s6 = sshll.u32 %s837_s5, 4  ;;  %s643_s6 = int_to_ptr.vmem [resolvable:$true] %s642_s6 }
 0x37d   :  { %v564_v20 = vmul.f32 %v1075_v13, %v1075_v13  ;;  %v554_v22 = vadd.f32 %v553_v19, %v1075_v13 }
 0x37f   :  { %v567_v25 = vadd.f32 %v566_v23, %v564_v20 }
 0x382   :  { %v544_v21 = vpop.f32.mrf.mxu3 }
 0x383   :  { %v550_v24 = vadd.f32 %v544_v21, %v499_v17 }
 0x385   :  { %v555_v26 = vadd.f32 %v554_v22, %v550_v24  ;;  %v565_v27 = vmul.f32 %v550_v24, %v550_v24 }
 0x387   :  { %v556_v28 = vrot.slane %v555_v26, 4  ;;  %v568_v32 = vadd.f32 %v567_v25, %v565_v27 }
 0x389   :  { %v557_v33 = vadd.f32 %v556_v28, %v555_v26  ;;  %v569_v34 = vrot.slane %v568_v32, 4 }
 0x38b   :  { %v558_v35 = vrot.slane %v557_v33, 2  ;;  %v570_v36 = vadd.f32 %v569_v34, %v568_v32 }
 0x38d   :  { %v559_v37 = vadd.f32 %v558_v35, %v557_v33  ;;  %v571_v38 = vrot.slane %v570_v36, 2 }
 0x38f   :  { %v560_v42 = vrot.slane %v559_v37, 1  ;;  %v572_v29 = vadd.f32 %v571_v38, %v570_v36 }
 0x391   :  { %v573_v44 = vrot.slane %v572_v29, 1  ;;  %v561_v31 = vadd.f32 %v560_v42, %v559_v37 }
 0x393   :  { %v574_v46 = vadd.f32 %v573_v44, %v572_v29 }
 0x395   :  { %v575_v45 = vsel %vm330_vm6, %v561_v31, %v574_v46 }
 0x396   :  { %576 = vrot.lane.b32.xlu2 %v575_v45, %s831_s10 }
 0x3f0   :  { %v577_v30 = vpop.permute.xlu2 %576 }
 0x3f1   :  { %v578_v47 = vadd.f32 %v577_v30, %v575_v45 }
 0x3f3   :  { %579 = vrot.lane.b32.xlu2 %v578_v47, %s834_s4 }
 0x44d   :  { %v580_v48 = vpop.permute.xlu2 %579 }
 0x44e   :  { %v581_v49 = vadd.f32 %v580_v48, %v578_v47 }
 0x450   :  { %582 = vrot.lane.b32.xlu0 %v581_v49, %s835_s16 }
 0x4c2   :  { %v583_v50 = vpop.permute.xlu0 %582 }
 0x4c3   :  { %v584_v51 = vadd.f32 %v583_v50, %v581_v49 }
 0x4c5   :  { %585 = vrot.lane.b32.xlu1 %v584_v51, %s836_s17 }
 0x537   :  { %v586_v52 = vpop.permute.xlu1 %585 }
 0x538   :  { %v587_v53 = vadd.f32 %v586_v52, %v584_v51 }
 0x53a   :  { %v588_v54 = vmul.f32 0.001953125, %v587_v53 }
 0x53c   :  { %v589_v55 = vmul.f32 %v588_v54, %v588_v54  ;;  %v609_v2 = vperm.slane %v588_v54, 0 }
 0x53e   :  { %v591_v56 = vrot.slane %v589_v55, 7  ;;  %v610_v5 = vsub.f32 %v1073_v41, %v609_v2  ;;  %v611_v6 = vsub.f32 %v1071_v11, %v609_v2  ;;  %v612_v7 = vsub.f32 %v1075_v13, %v609_v2 }
 0x53f   :  { %v613_v8 = vsub.f32 %v550_v24, %v609_v2 }
 0x540   :  { %v593_v57 = vsub.f32 %v588_v54, %v591_v56 }
 0x542   :  { %v594_v58 = vadd.f32 1e-05, %v593_v57 }
 0x544   :  { %725 = vrsqrt.f32 %v594_v58  ;;  %vm601_vm11 = vweird.f32 %v594_v58 }
 0x54a   :  { %v726_v61 = vpop.eup %725 }
 0x54b   :  { %v596_v12 = vmul.f32 %v726_v61, %v594_v58  ;;  %vm602_vm10 = vweird.f32 %v726_v61 }
 0x54c   :  { %vm603_vm12 = vmor %vm601_vm11, %vm602_vm10 }
 0x54d   :  { %v597_v59 = vmul.f32 %v726_v61, %v596_v12 }
 0x54f   :  { %v598_v60 = vmul.f32 0.5, %v597_v59 }
 0x551   :  { %v599_v63 = vsub.f32 1.5, %v598_v60 }
 0x553   :  { %v600_v1 = vmul.f32 %v726_v61, %v599_v63 }
 0x555   :  { %v604_v4 = vsel %vm603_vm12, %v726_v61, %v600_v1 }
 0x556   :  { %v608_v3 = vmul.f32 %v721_v0, %v604_v4 }
 0x558   :  { %v614_v9 = vperm.slane %v608_v3, 1 }
 0x55a   :  { %v615_v14 = vmul.f32 %v614_v9, %v610_v5  ;;  %v616_v15 = vmul.f32 %v614_v9, %v611_v6  ;;  %v617_v16 = vmul.f32 %v614_v9, %v612_v7  ;;  %v618_v18 = vmul.f32 %v614_v9, %v613_v8 }
 0x55c   :  { %v622_v17 = vadd.f32 %v722_v10, %v615_v14  ;;  %v623_v19 = vadd.f32 %v722_v10, %v616_v15  ;;  %v624_v20 = vadd.f32 %v722_v10, %v617_v16  ;;  %v625_v21 = vadd.f32 %v722_v10, %v618_v18 }
 0x55e   :  { %v626_v41 = vadd.f32 %v622_v17, %v896_v39  ;;  %v627_v11 = vadd.f32 %v623_v19, %v898_v40  ;;  %v628_v13 = vadd.f32 %v624_v20, %v920_v62  ;;  %v629_v22 = vadd.f32 %v625_v21, %v902_v43 }
 0x560   :  { %v630_v23 = vmax.f32 %v626_v41, 0.0  ;;  %v631_v24 = vmax.f32 %v627_v11, 0.0  ;;  %v632_v25 = vmax.f32 %v628_v13, 0.0  ;;  %v633_v26 = vmax.f32 %v629_v22, 0.0 }
 0x562   :  { %634 = vst [vmem:[#allocation8] sm:$0xff] %v630_v23 }
 0x563   :  { %635 = vst [vmem:[#allocation8 + $0x8] sm:$0xff] %v631_v24 }
 0x564   :  { %636 = vst [vmem:[#allocation8 + $0x10] sm:$0xff] %v632_v25 }
 0x565   :  { %637 = vst [vmem:[#allocation8 + $0x18] sm:$0xff] %v633_v26 }
 0x566   :  { %650 = dma.vmem_to_hbm [thread:$0]  %s643_s6, 512, %s645_s26, [#allocation4], %s830_s9, %s830_s9, %s831_s10  }
 0x567   :  { %827 = dma.done.wait [#allocation4], 512  }
 0x568   :  { %828 = vsyncadd [#allocation4], 4294966784 }
 0x569   :  { %655 = vsyncpa [#allocation3], 1 }
 0x56a   :  { %656 = vsyncpa [#allocation6], 1 }
 0x56b   :  { %657 = vsyncpa [#allocation4], 1 }

</bundles_post_ra>
